<compile_context>
chip_gen: v7x
topology: tpu7x:2x2x1
jax: 0.10.0
libtpu: 0.0.40
codegen_flags: <defaults>
</compile_context>

<pallas_src>
import functools

import jax
import jax.numpy as jnp
from jax.experimental import pallas as pl
from jax.experimental.pallas import tpu as pltpu


def _round_up(x: int, m: int) -> int:
    return ((x + m - 1) // m) * m


# --------------------------------------------------------------------------
# Fast path: VMEM-resident table, one-hot @ table on the MXU.
# --------------------------------------------------------------------------
def _encoder_onehot_kernel(idx_ref, table_ref, out_ref, *, num_values: int):
    # idx_ref:   VMEM [TB, 1] int32
    # table_ref: VMEM [V, D]   (full table, resident across the grid)
    # out_ref:   VMEM [TB, D]
    idx = idx_ref[...]                                   # (TB, 1)
    # forward(): indices >= num_values are remapped to 0.
    idx = jnp.where(idx >= num_values, 0, idx)
    # TODO(synk): PyTorch nn.Embedding errors on negative indices; clamp to 0
    # here so the gather stays in bounds.
    idx = jnp.maximum(idx, 0)

    tb = idx.shape[0]
    cols = jax.lax.broadcasted_iota(jnp.int32, (tb, num_values), 1)
    onehot = (cols == idx).astype(table_ref.dtype)       # (TB, V)
    out_ref[...] = jnp.dot(
        onehot, table_ref[...], preferred_element_type=jnp.float32
    ).astype(out_ref.dtype)


# --------------------------------------------------------------------------
# Fallback path: table stays in HBM, per-row DMA gather, double-buffered
# across grid steps.
# --------------------------------------------------------------------------
def _encoder_gather_kernel(
    idx_ref,      # SMEM  [B_pad] int32   (scalar prefetch)
    table_hbm,    # HBM   [V, D]          (memory_space=pl.ANY, no auto-DMA)
    out_ref,      # VMEM  [TB, D]         (pipelined output block)
    rows_vmem,    # VMEM  [2, TB, D]      cross-step double buffer
    copy_sems,    # DMA semaphores, shape (2,)  -- one shared sem per slot
    *,
    tile_b: int,
    num_values: int,
):
    t = pl.program_id(0)
    nt = pl.num_programs(0)
    slot = t % 2

    def issue_tile(tile_idx, slot_idx):
        base = tile_idx * tile_b

        def body(r, carry):
            raw = idx_ref[base + r]
            # forward(): indices >= num_values are remapped to 0.
            safe = jnp.where(raw >= num_values, 0, raw)
            # TODO(synk): PyTorch nn.Embedding errors on negative indices;
            # clamp to 0 so the DMA stays in bounds.
            safe = jnp.maximum(safe, 0)
            pltpu.make_async_copy(
                table_hbm.at[safe],
                rows_vmem.at[slot_idx, r],
                copy_sems.at[slot_idx],
            ).start()
            return carry

        jax.lax.fori_loop(0, tile_b, body, 0, unroll=8)

    # Prime the pipeline: tile 0's gathers are issued on the first grid step.
    @pl.when(t == 0)
    def _():
        issue_tile(0, 0)

    # Prefetch the NEXT tile's rows into the other slot *before* waiting on
    # the current slot (this also keeps the SMEM scalar reads ahead of the
    # DMA waits, which would otherwise break sst->sld forwarding).
    @pl.when(t + 1 < nt)
    def _():
        issue_tile(t + 1, 1 - slot)

    # Wait for the current tile's gathers: one wait per row copy on the shared
    # per-slot semaphore.  All copies have identical (D,) shapes, so the
    # rebuilt descriptor (row-0 source) waits for exactly one row's worth.
    def wait_body(r, carry):
        pltpu.make_async_copy(
            table_hbm.at[0], rows_vmem.at[slot, r], copy_sems.at[slot]
        ).wait()
        return carry

    jax.lax.fori_loop(0, tile_b, wait_body, 0, unroll=8)

    # Lane-dense (TB, D) writeback; Pallas pipelines the HBM store.
    out_ref[...] = rows_vmem[slot]


# --------------------------------------------------------------------------
# Wrapper
# --------------------------------------------------------------------------
def encoder_forward(
    categorical_column: jax.Array,
    table: jax.Array,
    *,
    tile_b: int = 256,
    force_hbm_gather: bool = False,
) -> jax.Array:
    """categorical_column: [B] (any int dtype), table: [V, D] -> [B, D]."""
    b = categorical_column.shape[0]
    v, d = table.shape
    itemsize = jnp.dtype(table.dtype).itemsize

    # Dtype-aware batch tile: multiple of the packed sublane tile
    # (8 for f32, 16 for bf16, 32 for int8/fp8), capped at `tile_b`.
    sublane = max(8, 32 // itemsize)
    tb = max(sublane, min(tile_b, _round_up(b, sublane)))
    tb = _round_up(tb, sublane)
    n_tiles = pl.cdiv(b, tb)
    # Prefer >= 2 grid steps so a "parallel" batch axis can split across the
    # two TensorCores on v7x (and so the demo exercises the pipeline).
    while n_tiles < 2:
        new_tb = _round_up(tb // 2, sublane)
        if new_tb >= tb or new_tb < sublane:
            break
        tb = new_tb
        n_tiles = pl.cdiv(b, tb)
    b_pad = n_tiles * tb

    idx = categorical_column.astype(jnp.int32)
    if b_pad != b:
        # Pad with index 0 (always valid); padded rows are sliced off below.
        idx = jnp.pad(idx, (0, b_pad - b))

    table_bytes = v * d * itemsize
    # Fast path budget: stays well inside v7x's 64 MiB/TC VMEM even with
    # double-buffered blocks, and keeps the one-hot MXU cost sane.
    use_fast = (not force_hbm_gather) and table_bytes <= (16 << 20) and v <= 1024
    # TODO(synk): a VMEM-resident table with large V (where one-hot matmul is
    # wasteful) would want an in-VMEM row gather; it falls back to the HBM
    # gather path here.

    if use_fast:
        vmem_limit = min(
            48 << 20,
            max(16 << 20, 2 * table_bytes + 4 * tb * d * itemsize + (4 << 20)),
        )
        cost = pl.CostEstimate(
            flops=2 * b_pad * v * d,
            transcendentals=0,
            bytes_accessed=b_pad * d * itemsize + table_bytes + b_pad * 4,
        )
        out = pl.pallas_call(
            functools.partial(_encoder_onehot_kernel, num_values=v),
            out_shape=jax.ShapeDtypeStruct((b_pad, d), table.dtype),
            grid=(n_tiles,),
            in_specs=[
                pl.BlockSpec((tb, 1), lambda t: (t, 0)),   # indices
                pl.BlockSpec((v, d), lambda t: (0, 0)),    # whole table in VMEM
            ],
            out_specs=pl.BlockSpec((tb, d), lambda t: (t, 0)),
            compiler_params=pltpu.CompilerParams(
                dimension_semantics=("parallel",),
                vmem_limit_bytes=int(vmem_limit),
            ),
            cost_estimate=cost,
        )(idx.reshape(b_pad, 1), table)
    else:
        vmem_limit = min(
            48 << 20, max(16 << 20, 6 * tb * d * itemsize + (4 << 20))
        )
        cost = pl.CostEstimate(
            flops=0,
            transcendentals=0,
            bytes_accessed=2 * b_pad * d * itemsize + b_pad * 4,
        )
        out = pl.pallas_call(
            functools.partial(_encoder_gather_kernel, tile_b=tb, num_values=v),
            out_shape=jax.ShapeDtypeStruct((b_pad, d), table.dtype),
            grid_spec=pltpu.PrefetchScalarGridSpec(
                num_scalar_prefetch=1,                  # idx -> SMEM
                grid=(n_tiles,),
                in_specs=[
                    pl.BlockSpec(memory_space=pl.ANY),  # table stays in HBM
                ],
                out_specs=pl.BlockSpec((tb, d), lambda t, idx_ref: (t, 0)),
                scratch_shapes=[
                    pltpu.VMEM((2, tb, d), table.dtype),
                    pltpu.SemaphoreType.DMA((2,)),
                ],
            ),
            compiler_params=pltpu.CompilerParams(
                # Cross-step double buffering couples consecutive grid steps,
                # so this axis must stay sequential ("arbitrary").
                dimension_semantics=("arbitrary",),
                vmem_limit_bytes=int(vmem_limit),
            ),
            cost_estimate=cost,
        )(idx, table)

    return out[:b] if b_pad != b else out


if __name__ == "__main__":
    key = jax.random.PRNGKey(0)
    k_idx, k_tab = jax.random.split(key)

    batch = 16
    num_values = 64
    dim = 128  # lane-dense embedding dim

    # deterministic "parameters" for the concrete _core (embedding table)
    table = jax.random.normal(k_tab, (num_values, dim), dtype=jnp.float32)

    # categorical column with some deliberately out-of-bound entries
    categorical_column = jax.random.randint(
        k_idx, (batch,), minval=0, maxval=num_values + 8, dtype=jnp.int32
    )

    # reference (pure JAX)
    sel = jnp.where(categorical_column >= num_values, 0, categorical_column)
    ref = table[sel]

    # Fast path (table is 32 KiB -> VMEM-resident one-hot @ MXU).
    out_fast = jax.block_until_ready(encoder_forward(categorical_column, table))
    assert out_fast.shape == (batch, dim)
    assert jnp.allclose(out_fast, ref, atol=1e-5), "fast path mismatch"

    # HBM row-gather path (forced), exercising the double-buffered DMA gather.
    out_gather = jax.block_until_ready(
        encoder_forward(categorical_column, table, force_hbm_gather=True)
    )
    assert out_gather.shape == (batch, dim)
    assert jnp.allclose(out_gather, ref, atol=1e-6), "gather path mismatch"

    print("KERNEL_OK")
</pallas_src>

<mosaic_0001>
module attributes {stable_mosaic.version = 11 : i64} {
  func.func @_encoder_onehot_kernel(%arg0: i32, %arg1: memref<8x1xi32, #tpu.memory_space<vmem>>, %arg2: memref<64x128xf32, #tpu.memory_space<vmem>>, %arg3: memref<8x128xf32, #tpu.memory_space<vmem>>) attributes {dimension_semantics = [#tpu.dimension_semantics<parallel>], iteration_bounds = array<i64: 2>, scalar_prefetch = 0 : i64, scratch_operands = 0 : i64, tpu.core_type = #tpu.core_type<tc>, window_params = [{transform_indices = @transform_0, window_bounds = array<i64: 8, 1>}, {pipeline_mode = #tpu.pipeline_mode<synchronous>, transform_indices = @transform_1, window_bounds = array<i64: 64, 128>}, {transform_indices = @transform_2, window_bounds = array<i64: 8, 128>}]} {
    %c0 = arith.constant 0 : index
    %c0_0 = arith.constant 0 : index
    %0 = vector.load %arg1[%c0, %c0_0] : memref<8x1xi32, #tpu.memory_space<vmem>>, vector<8x1xi32>
    %c64_i32 = arith.constant 64 : i32
    %1 = vector.broadcast %c64_i32 : i32 to vector<8x1xi32>
    %2 = arith.cmpi sge, %0, %1 : vector<8x1xi32>
    %c0_i32 = arith.constant 0 : i32
    %3 = vector.broadcast %c0_i32 : i32 to vector<8x1xi32>
    %4 = arith.select %2, %3, %0 : vector<8x1xi1>, vector<8x1xi32>
    %c0_i32_1 = arith.constant 0 : i32
    %5 = vector.broadcast %c0_i32_1 : i32 to vector<8x1xi32>
    %6 = arith.maxsi %4, %5 : vector<8x1xi32>
    %7 = tpu.iota {dimensions = array<i32: 1>} : vector<8x64xi32>
    %8 = vector.broadcast %6 : vector<8x1xi32> to vector<8x64xi32>
    %9 = arith.cmpi eq, %7, %8 : vector<8x64xi32>
    %10 = arith.extui %9 : vector<8x64xi1> to vector<8x64xi32>
    %11 = arith.sitofp %10 : vector<8x64xi32> to vector<8x64xf32>
    %c0_2 = arith.constant 0 : index
    %c0_3 = arith.constant 0 : index
    %12 = vector.load %arg2[%c0_2, %c0_3] : memref<64x128xf32, #tpu.memory_space<vmem>>, vector<64x128xf32>
    %cst = arith.constant dense<0.000000e+00> : vector<8x128xf32>
    %13 = tpu.matmul %11, %12, %cst {dimension_numbers = #tpu.dot_dimension_numbers<[1], [0], [0], [1], [0, 0, 1, 1], [], []>} : vector<8x64xf32>, vector<64x128xf32>, vector<8x128xf32> -> vector<8x128xf32>
    %c0_4 = arith.constant 0 : index
    %c0_5 = arith.constant 0 : index
    %14 = vector.load %arg3[%c0_4, %c0_5] : memref<8x128xf32, #tpu.memory_space<vmem>>, vector<8x128xf32>
    tpu.vector_store %arg3[%c0_4, %c0_5], %13 {strides = array<i32>} : memref<8x128xf32, #tpu.memory_space<vmem>>, vector<8x128xf32>,
    return
  }
  func.func @transform_0(%arg0: i32) -> (i32, i32) {
    %c0_i32 = arith.constant 0 : i32
    %c0_i32_0 = arith.constant 0 : i32
    return %arg0, %c0_i32 : i32, i32
  }
  func.func @transform_1(%arg0: i32) -> (i32, i32) {
    %c0_i32 = arith.constant 0 : i32
    %c0_i32_0 = arith.constant 0 : i32
    %c0_i32_1 = arith.constant 0 : i32
    return %c0_i32, %c0_i32_0 : i32, i32
  }
  func.func @transform_2(%arg0: i32) -> (i32, i32) {
    %c0_i32 = arith.constant 0 : i32
    %c0_i32_0 = arith.constant 0 : i32
    return %arg0, %c0_i32 : i32, i32
  }
}

</mosaic_0001>

<bundles_post_ra>
// kernel: tpu_custom_call.1
= control target key start
LH: loop header
LB: loop body
LE: loop exit
PB: predicated region body
PF: predicated region fallthrough
CT: control target
= control target key end

     0   :  { %7 = vsyncpa [#allocation3], 0  ;;  %s700_s0 = inlined_call_operand.vmem [shape: s32[16,1], index: 0, kind: input, shape index: {}]   ;;  %s701_s1 = inlined_call_operand.hbm [shape: f32[64,128], index: 1, kind: input, shape index: {}]   ;;  %s702_s2 = inlined_call_operand.hbm [shape: f32[16,128], index: 2, kind: output, shape index: {}]  }
   0x1   :  { %8 = vsyncpa [#allocation4], 0 }
   0x2   :  { %10 = vsyncpa [#allocation4 + $0x1], 0  ;;  %s565_s9 = smov 0   ;;  %s567_s10 = smov 0  }
   0x3   :  { %s569_s11 = smov 0   ;;  %s571_s12 = smov 0  }
   0x4 LB: > { %s586_s13 = sadd.s32 4294967295, %s540_s12   ;;  %s335_s14 = sadd.s32 4294967294, %s540_s12   ;;  %s540_s12 = sphi %s571_s12, %s718_s12   ;;  %s536_s11 = sphi %s569_s11, %s717_s11   ;;  %s532_s10 = sphi %s567_s10, %s716_s10   ;;  %s528_s9 = sphi %s565_s9, %s715_s9  }
   0x5   : > { %s590_s15 = sadd.s32 1, %s540_s12   ;;  %s70_s16 = sadd.s32 1, %s536_s11 }
   0x6   : > { %s67_s17 = ssub.s32 %s540_s12, %s590_s15  ;;  %p80_p0 = scmp.ne.s32.totalorder %s536_s11, %s532_s10 }
   0x7   : > { %p68_p1 = scmp.eq.s32.totalorder %s67_s17, 0  ;;  %p81_p2 = scmp.eq.s32.totalorder %s586_s13, 1 }
   0x8   : > { %p86_p3 = scmp.ne.s32.totalorder %s532_s10, %s528_s9  ;;  %p87_p4 = scmp.eq.s32.totalorder %s335_s14, 1 }
   0x9   : > { %s601_s18 = scalar_select %p68_p1, %s536_s11, %s70_s16  }
   0xa   : > { %p603_p5 = por %p81_p2, %p80_p0  ;;  %p607_p6 = por %p87_p4, %p86_p3 }
   0xb   : > { %p336_p7 = scmp.ge.s32.totalorder %s540_s12, 1  ;;  %p94_p8 = scmp.lt.s32.totalorder %s540_s12, 3 }
   0xc   : > { %s706_s19 = scalar_select %p603_p5, 1, 0 }
   0xd   : > { %s707_s20 = scalar_select %p607_p6, 1, 0 }
   0xe   : > { %p703_p9 = scmp.eq.s32.totalorder %s586_s13, 0  ;;  %p614_p10 = pnand %p336_p7, %p94_p8 }
   0xf   : > { %s542_s22 = smov [#allocation2]   ;;  %s446_s27 = scalar_lea.hbm %s701_s1, 1024 }
  0x10   : > { %s708_s21 = scalar_select %p614_p10, 1, 0 }
  0x11   : > { %s106_s23 = sshll.u32 %s542_s22, 4  ;;  %p395_p11 = pneg %p614_p10  ;;  %s107_s23 = int_to_ptr.vmem [resolvable:$true] %s106_s23 }
  0x12   : > { %p447_p13 = scmp.ne.s32.totalorder %s701_s1, %s446_s27  ;;  %p453_p3 = scmp.lt.u32.totalorder %s446_s27, %s701_s1 }
  0x13   : > { %p622_p12 = pnand %p703_p9, %p395_p11 }
  0x15   : > { %p448_p0 = pneg %p622_p12 }
  0x17   : > { %p449_p1 = pnand %p448_p0, %p447_p13 }
  0x19   : > { %p450_p2 = pneg %p449_p1 }
  0x1b   : > { %p455_p4 = pnand %p453_p3, %p450_p2 }
  0x1d   : > { %458 = shalt.err (!%p455_p4)
}
  0x1e   : > { %s459_s4 = scalar_lea.vmem %s107_s23, 1024  ;;  %p467_p9 = scmp.lt.s32.totalorder %s107_s23, %s107_s23 }
  0x1f   : > { %p460_p7 = scmp.ne.s32.totalorder %s107_s23, %s459_s4  ;;  %p468_p6 = scmp.lt.s32.totalorder %s459_s4, %s459_s4 }
  0x21   : > { %p462_p8 = pnand %p460_p7, %p448_p0  ;;  %p469_p5 = por %p468_p6, %p467_p9 }
  0x23   : > { %p463_p11 = pneg %p462_p8 }
  0x25   : > { %p470_p10 = pnand %p469_p5, %p463_p11 }
  0x27   : > { %473 = shalt.err (!%p470_p10)
}
  0x28   : > { %s543_s5 = smov 128   ;;  %s544_s6 = smov 8  }
  0x29   : > { %398 = dma.hbm_to_vmem [thread:$0]  (!%p622_p12), %s701_s1, 1024, %s107_s23, [#allocation3], %s543_s5, %s543_s5, %s544_s6  }
  0x2a   : > { %p710_p13 = scmp.ne.s32.totalorder %s708_s21, 0 }
  0x2b   : > { %p711_p1 = scmp.eq.s32.totalorder (!%p710_p13), %s586_s13, 0 }
  0x2c   : > { %129 = sbr.rel (%p710_p13) target bundleno = 419 (0x1a3), region = 28 }
  0x33   : > { %519 = dma.done.wait (%p711_p1), [#allocation3], 1024   ;;  %p712_p0 = pmov %p711_p1 }
  0x34   : > { %p150_p5 = scmp.lt.s32.totalorder %s586_s13, 1  ;;  %v545_v0 = vmov 0   ;;  %v546_v1 = vmov 0.0|0.0   ;;  %v167_v3 = vld [vmem:[#allocation2] sm:$0xff]  ;;  %v168_v4 = vld [vmem:[#allocation2 + $0x8] sm:$0xff]  ;;  %v169_v6 = vld [vmem:[#allocation2 + $0x10] sm:$0xff]  ;;  %v159_v18 = vlaneseq }
  0x35   : > { %521 = vsyncadd (%p712_p0), [#allocation3], 4294966272  ;;  %445 = vset.pattern.permute.xlu0 %v545_v0  ;;  %377 = vmatprep.subr.bf16.mxu0 %v546_v1  ;;  %v378_v5 = vpack.c.bf16 %v168_v4, %v167_v3  ;;  %v170_v7 = vld [vmem:[#allocation2 + $0x18] sm:$0xff]  ;;  %v171_v11 = vld [vmem:[#allocation2 + $0x20] sm:$0xff]  ;;  %vm547_vm2 = vmmov 0   ;;  %v548_v13 = vmov 0.0  }
  0x36   : > { %s151_s14 = scalar_select %p150_p5, %s586_s13, 1  ;;  %v381_v9 = vpack.c.bf16 %v170_v7, %v169_v6  ;;  %v172_v12 = vld [vmem:[#allocation2 + $0x28] sm:$0xff]  ;;  %374 = vmatprep.mubr.msk.f32.mxu0 %vm547_vm2, %v548_v13  ;;  %v173_v15 = vld [vmem:[#allocation2 + $0x30] sm:$0xff]  ;;  %v174_v16 = vld [vmem:[#allocation2 + $0x38] sm:$0xff]  ;;  %v160_v19 = vand.u32 127, %v159_v18  ;;  %vm175_vm3 = vcmask 523264  }
  0x37   : > { %379 = vmatpush3.bf16.msra.mxu0 %v378_v5  ;;  %v384_v14 = vpack.c.bf16 %v172_v12, %v171_v11  ;;  %v387_v17 = vpack.c.bf16 %v174_v16, %v173_v15  ;;  %s147_s23 = sand.u32 1, %s532_s10   ;;  %s346_s27 = sshll.u32 %s586_s13, 7 }
  0x38   : > { %s342_s16 = sshll.u32 %s151_s14, 3  ;;  %380 = vmatprep.subr.bf16.mxu0 %v546_v1  ;;  %s341_s24 = sshll.u32 %s147_s23, 3 }
  0x39   : > { %s153_s21 = scalar_lea.vmem %s700_s0, %s342_s16  ;;  %s149_s25 = scalar_lea.vmem [#allocation5], %s341_s24 }
  0x3a   : > { %v154_v2 = vld [vmem:[%s153_s21] sm:$0xff]  ;;  %s264_s26 = sshll.u32 %s149_s25, 4  ;;  %s660_s30 = scalar_lea.hbm %s702_s2, %s346_s27  ;;  %s655_s26 = int_to_ptr.vmem [resolvable:$true] %s264_s26 }
  0x3b   : > { %vm155_vm0 = vcmp.ge.s32.totalorder %v154_v2, 64  ;;  %382 = vmatpush3.bf16.msra.mxu0 %v381_v9  ;;  %s251_s3 = scalar_lea.sflag [#allocation4], %s147_s23  ;;  %s474_s4 = scalar_lea.vmem %s655_s26, 128 }
  0x3c   : > { %v156_v8 = vsel %vm155_vm0, 0, %v154_v2  ;;  %383 = vmatprep.subr.bf16.mxu0 %v546_v1  ;;  %p475_p6 = scmp.ne.s32.totalorder %s655_s26, %s474_s4  ;;  %p713_p9 = scmp.ne.s32.totalorder %s706_s19, 0 }
  0x3d   : > { %vm157_vm1 = vcmp.gt.s32.totalorder %v156_v8, 0  ;;  %s549_s13 = smov [#allocation5]  }
  0x3e   : > { %v158_v10 = vsel %vm157_vm1, %v156_v8, 0  ;;  %p476_p10 = pnand %p475_p6, %p713_p9  ;;  %s478_s5 = sshll.u32 %s549_s13, 4  ;;  %s479_s5 = int_to_ptr.vmem [resolvable:$false] %s478_s5 }
  0x3f   : > { %162 = vperm.xlu0 %445, %v158_v10   ;;  %385 = vmatpush3.bf16.msra.mxu0 %v384_v14  ;;  %s480_s6 = scalar_lea.vmem %s479_s5, 256  ;;  %p481_p2 = scmp.lt.s32.totalorder %s655_s26, %s479_s5 }
  0x40   : > { %386 = vmatprep.subr.bf16.mxu0 %v546_v1  ;;  %p477_p12 = pneg %p476_p10  ;;  %p482_p3 = scmp.lt.s32.totalorder %s480_s6, %s474_s4 }
  0x42   : > { %p483_p4 = por %p482_p3, %p481_p2 }
  0x43   : > { %388 = vmatpush3.bf16.msra.mxu0 %v387_v17 }
  0x44   : > { %p484_p7 = pnand %p483_p4, %p477_p12 }
  0xbe   : > { %v163_v20 = vpop.permute.xlu0 %162 }
  0xbf   : > { %vm164_vm4 = vcmp.eq.s32.totalorder %v160_v19, %v163_v20 }
  0xc0   : > { %v343_v21 = vsel %vm164_vm4, 1.0, %v548_v13 }
  0xc1   : > { %375 = vmatmul.mubr.msk.f32.vlgmr.msra.gmra.mrb[0].mxu0 %vm175_vm3, %v343_v21 }
 0x194   : > { %v245_v22 = vpop.f32.mrb[0].mxu0 }
 0x195   : > { %249 = vst [vmem:[%s149_s25] sm:$0xff] %v245_v22  ;;  %v376_v23 = vpop.f32.mrb[1].mxu0 }
 0x196   : > { %487 = shalt.err (!%p484_p7)
}
 0x197   : > { %s488_s7 = scalar_lea.hbm %s660_s30, 128  ;;  %s492_s16 = scalar_lea.hbm %s702_s2, 256 }
 0x198   : > { %p489_p8 = scmp.ne.s32.totalorder %s660_s30, %s488_s7  ;;  %p493_p1 = scmp.lt.u32.totalorder %s660_s30, %s702_s2 }
 0x199   : > { %p494_p0 = scmp.lt.u32.totalorder %s492_s16, %s488_s7  ;;  %p496_p6 = scmp.lt.u32.totalorder %s488_s7, %s660_s30 }
 0x19a   : > { %p490_p11 = pnand %p489_p8, %p713_p9 }
 0x19b   : > { %p495_p5 = por %p494_p0, %p493_p1 }
 0x19c   : > { %p491_p13 = pneg %p490_p11 }
 0x19d   : > { %p497_p10 = por %p496_p6, %p495_p5 }
 0x19f   : > { %p498_p12 = pnand %p497_p10, %p491_p13 }
 0x1a1   : > { %501 = shalt.err (!%p498_p12)
}
 0x1a2   : > { %393 = dma.vmem_to_hbm [thread:$0]  (%p713_p9), %s655_s26, 128, %s660_s30, %s251_s3  }
 0x1a3 PF: > { %p405_p2 = scmp.ge.s32.totalorder %s540_s12, 2  ;;  %s276_s21 = sand.u32 1, %s528_s9  }
 0x1a4   : > { %p714_p3 = scmp.ne.s32.totalorder %s707_s20, 0  ;;  %s277_s23 = scalar_lea.sflag [#allocation4], %s276_s21 }
 0x1a6   : > { %p400_p4 = pnand %p405_p2, %p714_p3 }
 0x1a8   : > { %523 = dma.done.wait (!%p400_p4), %s277_s23, 128  }
 0x1a9   : > { %525 = vsyncadd (!%p400_p4), %s277_s23, 4294967168  ;;  %p13_p7 = scmp.ge.s32.totalorder %s590_s15, 4   ;;  %s715_s9 = smov %s532_s10 }
 0x1aa   : > { %s716_s10 = smov %s536_s11  ;;  %s717_s11 = smov %s601_s18 }
 0x1ab   : > { %s718_s12 = smov %s590_s15  ;;  %15 = sbr.rel (!%p13_p7) target bundleno = 4 (0x4), region = 68 }
 0x1b2   :  { %282 = vsyncpa [#allocation3], 1 }
 0x1b3   :  { %284 = vsyncpa [#allocation3 + $0x1], 1 }
 0x1b4   :  { %285 = vsyncpa [#allocation4], 1 }
 0x1b5   :  { %287 = vsyncpa [#allocation4 + $0x1], 1 }

</bundles_post_ra>
